<compile_context>
chip_gen: v7x
topology: tpu7x:2x2x1
jax: 0.10.0
libtpu: 0.0.40
codegen_flags: <defaults>
</compile_context>

<pallas_src>
import functools

import jax
import jax.numpy as jnp
from jax import lax
from jax.experimental import pallas as pl
from jax.experimental.pallas import tpu as pltpu

EPSILON = 1e-5

_CHUNK_F32_BYTES = 2 * 1024 * 1024  # per-block f32 budget for the chunked path


@functools.lru_cache(maxsize=None)
def _budgets():
    """Generation-aware tile / scoped-VMEM budgets."""
    cap = None
    try:
        cap = getattr(pltpu.get_tpu_info(), "vmem_capacity_bytes", None)
    except Exception:
        cap = None
    if cap is not None and cap >= 96 * 1024 * 1024:
        # 128 MiB VMEM parts (v5e / v6e): bigger tiles, generous scoped limit.
        return {"target_tile": 8 << 20, "f32_cap": 8 << 20, "vmem_limit": 96 << 20}
    # 64 MiB-per-core parts (v7x) or unknown: keep the double-buffered
    # footprint (2x in + 2x out + f32 temporaries) well clear of the ceiling.
    return {"target_tile": 4 << 20, "f32_cap": 4 << 20, "vmem_limit": 40 << 20}


# ----------------------------------------------------------------------------
# Main path: each block is (rows, H*W); stats + normalize in one kernel.
# ----------------------------------------------------------------------------
def _instance_norm_kernel(x_ref, o_ref, *, eps):
    # Single traversal for the statistics: sum and sum-of-squares, so the
    # centered tile is never materialized as an extra full-tile f32 temporary.
    x = x_ref[...].astype(jnp.float32)
    mean = jnp.mean(x, axis=-1, keepdims=True)
    mean_sq = jnp.mean(x * x, axis=-1, keepdims=True)
    var = jnp.maximum(mean_sq - mean * mean, 0.0)  # clamp: rounding can go <0
    inv = 1.0 / (jnp.sqrt(var) + eps)              # eps on std, not var
    o_ref[...] = ((x - mean) * inv).astype(o_ref.dtype)


def _pick_tiling(nc, hw, itemsize, cfg):
    """Choose (rows_per_block, num_blocks): large legal tiles, >=2..4 grid
    steps when possible, exact divisors only if they keep the tile big."""
    sub = max(8, 32 // max(1, itemsize))  # 8 for f32, 16 for bf16, 32 for int8

    rows = (cfg["target_tile"] // max(1, hw * itemsize)) // sub * sub
    rows_f32 = (cfg["f32_cap"] // max(1, hw * 4)) // sub * sub
    rows = max(sub, min(rows, rows_f32))

    # Never emit a 1-step grid when we can have several: keeps the pipeline
    # overlapping prefetch/compute/writeback and (v7x) spans both TensorCores.
    if nc >= 2 * sub:
        desired_blocks = min(4, nc // sub)
        rows = min(rows, max(sub, (nc // desired_blocks) // sub * sub))

    if nc <= rows:
        # Tiny problem: single full-extent block (block == full dims is legal).
        return nc, 1

    # Prefer an exact multiple-of-`sub` divisor of nc, but only if it keeps
    # the tile >= half the budget — otherwise the masked trailing block of an
    # uneven grid is far cheaper than many tiny grid steps.
    floor = max(sub, rows // 2)
    d = rows
    while d >= floor:
        if nc % d == 0:
            return d, nc // d
        d -= sub

    # Uneven grid: trailing partial block is masked on store; rows are fully
    # independent so padded garbage rows never contaminate valid output.
    return rows, pl.cdiv(nc, rows)


def _instance_norm_rows(x2, eps, cfg):
    nc, hw = x2.shape
    rows, num_blocks = _pick_tiling(nc, hw, x2.dtype.itemsize, cfg)
    kernel = functools.partial(_instance_norm_kernel, eps=eps)
    return pl.pallas_call(
        kernel,
        out_shape=jax.ShapeDtypeStruct((nc, hw), x2.dtype),
        grid_spec=pltpu.PrefetchScalarGridSpec(
            num_scalar_prefetch=0,
            grid=(num_blocks,),
            in_specs=[pl.BlockSpec((rows, hw), lambda i: (i, 0))],
            out_specs=pl.BlockSpec((rows, hw), lambda i: (i, 0)),
        ),
        compiler_params=pltpu.CompilerParams(
            dimension_semantics=("parallel",),
            vmem_limit_bytes=cfg["vmem_limit"],
        ),
    )(x2)


# ----------------------------------------------------------------------------
# Chunked two-pass path for huge H*W: bound VMEM for any spatial size.
# Pass 1 accumulates per-row sum / sum-of-squares over hw chunks ("arbitrary"
# axis) into small VMEM scratch, emitting per-row mean and 1/(std+eps).
# Pass 2 normalizes, fully parallel.
# ----------------------------------------------------------------------------
def _stats_kernel(x_ref, mean_ref, inv_ref, sum_sc, sq_sc, *, eps, hw, ch):
    c = pl.program_id(1)

    @pl.when(c == 0)
    def _():
        sum_sc[...] = jnp.zeros_like(sum_sc)
        sq_sc[...] = jnp.zeros_like(sq_sc)

    x = x_ref[...].astype(jnp.float32)
    # Mask the padded tail of the last hw chunk so it never enters the stats.
    pos = c * ch + lax.broadcasted_iota(jnp.int32, x.shape, 1)
    x = jnp.where(pos < hw, x, 0.0)
    sum_sc[...] += jnp.sum(x, axis=-1, keepdims=True)
    sq_sc[...] += jnp.sum(x * x, axis=-1, keepdims=True)

    @pl.when(c == pl.num_programs(1) - 1)
    def _():
        mean = sum_sc[...] * (1.0 / hw)
        var = jnp.maximum(sq_sc[...] * (1.0 / hw) - mean * mean, 0.0)
        mean_ref[...] = mean
        inv_ref[...] = 1.0 / (jnp.sqrt(var) + eps)


def _apply_kernel(x_ref, mean_ref, inv_ref, o_ref):
    x = x_ref[...].astype(jnp.float32)
    o_ref[...] = ((x - mean_ref[...]) * inv_ref[...]).astype(o_ref.dtype)


def _chunked_tiling(nc, hw, itemsize, cfg):
    sub = max(8, 32 // max(1, itemsize))
    if nc >= sub:
        rows = min((nc // sub) * sub, 64)
    else:
        rows = nc  # full-extent row block (legal: equals array dim)
    chunk_bytes = min(_CHUNK_F32_BYTES, cfg["f32_cap"] // 2)
    ch = (chunk_bytes // max(1, rows * 4)) // 128 * 128
    ch = max(128, min(ch, max(128, (hw // 128) * 128)))
    return rows, ch


def _instance_norm_chunked(x2, eps, cfg):
    nc, hw = x2.shape
    rows, ch = _chunked_tiling(nc, hw, x2.dtype.itemsize, cfg)
    n_r = pl.cdiv(nc, rows)
    n_c = pl.cdiv(hw, ch)

    stats_kernel = functools.partial(_stats_kernel, eps=eps, hw=hw, ch=ch)
    mean, inv = pl.pallas_call(
        stats_kernel,
        out_shape=(
            jax.ShapeDtypeStruct((nc, 1), jnp.float32),
            jax.ShapeDtypeStruct((nc, 1), jnp.float32),
        ),
        grid_spec=pltpu.PrefetchScalarGridSpec(
            num_scalar_prefetch=0,
            grid=(n_r, n_c),
            in_specs=[pl.BlockSpec((rows, ch), lambda r, c: (r, c))],
            out_specs=(
                pl.BlockSpec((rows, 1), lambda r, c: (r, 0)),
                pl.BlockSpec((rows, 1), lambda r, c: (r, 0)),
            ),
            scratch_shapes=[
                pltpu.VMEM((rows, 1), jnp.float32),
                pltpu.VMEM((rows, 1), jnp.float32),
            ],
        ),
        compiler_params=pltpu.CompilerParams(
            dimension_semantics=("parallel", "arbitrary"),
            vmem_limit_bytes=cfg["vmem_limit"],
        ),
    )(x2)

    out2 = pl.pallas_call(
        _apply_kernel,
        out_shape=jax.ShapeDtypeStruct((nc, hw), x2.dtype),
        grid_spec=pltpu.PrefetchScalarGridSpec(
            num_scalar_prefetch=0,
            grid=(n_r, n_c),
            in_specs=[
                pl.BlockSpec((rows, ch), lambda r, c: (r, c)),
                pl.BlockSpec((rows, 1), lambda r, c: (r, 0)),
                pl.BlockSpec((rows, 1), lambda r, c: (r, 0)),
            ],
            out_specs=pl.BlockSpec((rows, ch), lambda r, c: (r, c)),
        ),
        compiler_params=pltpu.CompilerParams(
            dimension_semantics=("parallel", "parallel"),
            vmem_limit_bytes=cfg["vmem_limit"],
        ),
    )(x2, mean, inv)
    return out2


# ----------------------------------------------------------------------------
# Public wrapper
# ----------------------------------------------------------------------------
def custom_instance_norm(x, epsilon=EPSILON):
    """x: (N, C, H, W) array. Returns instance-normalized array, same shape/dtype."""
    n, c, h, w = x.shape
    nc, hw = n * c, h * w
    x2 = x.reshape(nc, hw)  # row-major: free reshape, no data movement

    cfg = _budgets()
    itemsize = x.dtype.itemsize
    sub = max(8, 32 // max(1, itemsize))

    if hw * 4 * sub > cfg["f32_cap"]:
        # Even a minimal (sub, hw) block would blow the per-block f32 budget:
        # take the hw-chunked two-pass path (bounded VMEM for any H*W).
        out2 = _instance_norm_chunked(x2, epsilon, cfg)
    else:
        out2 = _instance_norm_rows(x2, epsilon, cfg)

    return out2.reshape(n, c, h, w)


def _reference(x, eps=EPSILON):
    # Mirrors the PyTorch forward exactly (biased std, eps added to std).
    mean = jnp.mean(x, axis=(2, 3), keepdims=True)
    std = jnp.sqrt(jnp.mean((x - mean) ** 2, axis=(2, 3), keepdims=True))
    return (x - mean) / (std + eps)


if __name__ == "__main__":
    key = jax.random.PRNGKey(0)
    k0, k1, k2, k3, k4 = jax.random.split(key, 5)

    # Primary small test (shape implied by the module: NCHW).
    x = jax.random.normal(k0, (2, 4, 16, 16), dtype=jnp.float32)
    out = jax.block_until_ready(custom_instance_norm(x))
    assert out.shape == x.shape and out.dtype == x.dtype
    assert jnp.allclose(out, _reference(x), atol=1e-4, rtol=1e-4)

    # Multi-block path with large, exactly-dividing tiles.
    xb = jax.random.normal(k1, (8, 256, 32, 32), dtype=jnp.float32)
    outb = jax.block_until_ready(custom_instance_norm(xb))
    assert jnp.allclose(outb, _reference(xb), atol=1e-4, rtol=1e-4)

    # Full-extent block path with non-(8,128)-aligned dims.
    xo = jax.random.normal(k2, (3, 5, 12, 12), dtype=jnp.float32)
    outo = jax.block_until_ready(custom_instance_norm(xo))
    assert jnp.allclose(outo, _reference(xo), atol=1e-4, rtol=1e-4)

    # Uneven grid: N*C = 1004 has no large multiple-of-8 divisor -> masked
    # trailing row block must be handled correctly.
    xu = jax.random.normal(k3, (4, 251, 16, 16), dtype=jnp.float32)
    outu = jax.block_until_ready(custom_instance_norm(xu))
    assert jnp.allclose(outu, _reference(xu), atol=1e-4, rtol=1e-4)

    # Huge H*W: exercises the hw-chunked two-pass path (bounded VMEM),
    # including the masked partial trailing hw chunk.
    xh = jax.random.normal(k4, (1, 8, 600, 600), dtype=jnp.float32)
    outh = jax.block_until_ready(custom_instance_norm(xh))
    assert jnp.allclose(outh, _reference(xh), atol=1e-4, rtol=1e-4)

    print("KERNEL_OK")
</pallas_src>

<mosaic_0001>
module attributes {stable_mosaic.version = 11 : i64} {
  func.func @_instance_norm_kernel(%arg0: i32, %arg1: memref<8x256xf32, #tpu.memory_space<vmem>>, %arg2: memref<8x256xf32, #tpu.memory_space<vmem>>) attributes {dimension_semantics = [#tpu.dimension_semantics<parallel>], iteration_bounds = array<i64: 1>, scalar_prefetch = 0 : i64, scratch_operands = 0 : i64, tpu.core_type = #tpu.core_type<tc>, window_params = [{transform_indices = @transform_0, window_bounds = array<i64: 8, 256>}, {transform_indices = @transform_1, window_bounds = array<i64: 8, 256>}]} {
    %c0 = arith.constant 0 : index
    %c0_0 = arith.constant 0 : index
    %0 = vector.load %arg1[%c0, %c0_0] : memref<8x256xf32, #tpu.memory_space<vmem>>, vector<8x256xf32>
    %cst = arith.constant dense<0.000000e+00> : vector<8xf32>
    %1 = vector.multi_reduction <add>, %0, %cst [1] : vector<8x256xf32> to vector<8xf32>
    %2 = vector.shape_cast %1 : vector<8xf32> to vector<8x1xf32>
    %cst_1 = arith.constant 2.560000e+02 : f32
    %3 = vector.broadcast %cst_1 : f32 to vector<8x1xf32>
    %4 = arith.divf %2, %3 : vector<8x1xf32>
    %5 = arith.mulf %0, %0 : vector<8x256xf32>
    %cst_2 = arith.constant dense<0.000000e+00> : vector<8xf32>
    %6 = vector.multi_reduction <add>, %5, %cst_2 [1] : vector<8x256xf32> to vector<8xf32>
    %7 = vector.shape_cast %6 : vector<8xf32> to vector<8x1xf32>
    %cst_3 = arith.constant 2.560000e+02 : f32
    %8 = vector.broadcast %cst_3 : f32 to vector<8x1xf32>
    %9 = arith.divf %7, %8 : vector<8x1xf32>
    %10 = arith.mulf %4, %4 : vector<8x1xf32>
    %11 = arith.subf %9, %10 : vector<8x1xf32>
    %cst_4 = arith.constant 0.000000e+00 : f32
    %12 = vector.broadcast %cst_4 : f32 to vector<8x1xf32>
    %13 = arith.maximumf %11, %12 : vector<8x1xf32>
    %14 = math.sqrt %13 : vector<8x1xf32>
    %cst_5 = arith.constant 9.99999974E-6 : f32
    %15 = vector.broadcast %cst_5 : f32 to vector<8x1xf32>
    %16 = arith.addf %14, %15 : vector<8x1xf32>
    %cst_6 = arith.constant 1.000000e+00 : f32
    %17 = vector.broadcast %cst_6 : f32 to vector<8x1xf32>
    %18 = arith.divf %17, %16 : vector<8x1xf32>
    %19 = vector.broadcast %4 : vector<8x1xf32> to vector<8x256xf32>
    %20 = arith.subf %0, %19 : vector<8x256xf32>
    %21 = vector.broadcast %18 : vector<8x1xf32> to vector<8x256xf32>
    %22 = arith.mulf %20, %21 : vector<8x256xf32>
    %c0_7 = arith.constant 0 : index
    %c0_8 = arith.constant 0 : index
    %23 = vector.load %arg2[%c0_7, %c0_8] : memref<8x256xf32, #tpu.memory_space<vmem>>, vector<8x256xf32>
    tpu.vector_store %arg2[%c0_7, %c0_8], %22 {strides = array<i32>} : memref<8x256xf32, #tpu.memory_space<vmem>>, vector<8x256xf32>,
    return
  }
  func.func @transform_0(%arg0: i32) -> (i32, i32) {
    %c0_i32 = arith.constant 0 : i32
    %c0_i32_0 = arith.constant 0 : i32
    return %arg0, %c0_i32 : i32, i32
  }
  func.func @transform_1(%arg0: i32) -> (i32, i32) {
    %c0_i32 = arith.constant 0 : i32
    %c0_i32_0 = arith.constant 0 : i32
    return %arg0, %c0_i32 : i32, i32
  }
}

</mosaic_0001>

<bundles_post_ra>
// kernel: tpu_custom_call.1
= control target key start
LH: loop header
LB: loop body
LE: loop exit
PB: predicated region body
PF: predicated region fallthrough
CT: control target
= control target key end

     0   :  { %6 = vsyncpa [#allocation3], 0  ;;  %s158_s0 = inlined_call_operand.hbm [shape: f32[8,256], index: 0, kind: input, shape index: {}]   ;;  %s159_s1 = inlined_call_operand.hbm [shape: f32[8,256], index: 1, kind: output, shape index: {}]  }
   0x1   :  { %7 = vsyncpa [#allocation4], 0  ;;  %s122_s6 = smov [#allocation2]   ;;  %s74_s10 = scalar_lea.hbm %s158_s0, 256 }
   0x2   :  { %s14_s7 = sshll.u32 %s122_s6, 4  ;;  %p75_p0 = scmp.ne.s32.totalorder %s158_s0, %s74_s10  ;;  %s15_s7 = int_to_ptr.vmem [resolvable:$true] %s14_s7 }
   0x3   :  { %p78_p1 = scmp.lt.u32.totalorder %s74_s10, %s158_s0 }
   0x5   :  { %p80_p2 = pnand %p78_p1, %p75_p0 }
   0x7   :  { %83 = shalt.err (!%p80_p2)
}
   0x8   :  { %s84_s15 = scalar_lea.vmem %s15_s7, 256  ;;  %p89_p4 = scmp.lt.s32.totalorder %s15_s7, %s15_s7 }
   0x9   :  { %p85_p3 = scmp.ne.s32.totalorder %s15_s7, %s84_s15  ;;  %p90_p5 = scmp.lt.s32.totalorder %s84_s15, %s84_s15 }
   0xb   :  { %p91_p6 = por %p90_p5, %p89_p4 }
   0xd   :  { %p92_p7 = pnand %p91_p6, %p85_p3 }
   0xf   :  { %95 = shalt.err (!%p92_p7)
}
  0x10   :  { %17 = dma.hbm_to_vmem [thread:$0]  %s158_s0, 256, %s15_s7, [#allocation3]  }
  0x11   :  { %118 = dma.done.wait [#allocation3], 256  }
  0x12   :  { %119 = vsyncadd [#allocation3], 4294967040  ;;  %v21_v0 = vld [vmem:[#allocation2] sm:$0xff]  ;;  %v22_v1 = vld [vmem:[#allocation2 + $0x8] sm:$0xff]  ;;  %s123_s0 = smov [#allocation5]  }
  0x13   :  { %v23_v2 = vadd.f32 %v22_v1, %v21_v0  ;;  %v28_v3 = vmul.f32 %v21_v0, %v21_v0  ;;  %v29_v4 = vmul.f32 %v22_v1, %v22_v1  ;;  %s59_s18 = sshll.u32 %s123_s0, 4  ;;  %s60_s18 = int_to_ptr.vmem [resolvable:$true] %s59_s18 }
  0x14   :  { %s96_s19 = scalar_lea.vmem %s60_s18, 256  ;;  %p101_p9 = scmp.lt.s32.totalorder %s60_s18, %s60_s18 }
  0x15   :  { %24 = vadd.xlane.f32.xlu0 %v23_v2  ;;  %v30_v5 = vadd.f32 %v29_v4, %v28_v3  ;;  %p97_p8 = scmp.ne.s32.totalorder %s60_s18, %s96_s19  ;;  %p102_p10 = scmp.lt.s32.totalorder %s96_s19, %s96_s19 }
  0x17   :  { %p103_p11 = por %p102_p10, %p101_p9 }
  0x19   :  { %31 = vadd.xlane.f32.xlu0 %v30_v5  ;;  %p104_p12 = pnand %p103_p11, %p97_p8 }
  0xa2   :  { %v25_v6 = vpop.xlane.xlu0 %24 }
  0xa3   :  { %v27_v7 = vmul.f32 0.00390625, %v25_v6 }
  0xa5   :  { %v34_v9 = vmul.f32 %v27_v7, %v27_v7  ;;  %v47_v19 = vsub.f32 %v21_v0, %v27_v7  ;;  %v48_v20 = vsub.f32 %v22_v1, %v27_v7 }
  0xa6   :  { %v32_v8 = vpop.xlane.xlu0 %31 }
  0xa7   :  { %v33_v10 = vmul.f32 0.00390625, %v32_v8 }
  0xa9   :  { %v35_v11 = vsub.f32 %v33_v10, %v34_v9 }
  0xab   :  { %v36_v12 = vmax.f32 %v35_v11, 0.0 }
  0xad   :  { %70 = vrsqrt.f32 %v36_v12  ;;  %vm39_vm0 = vcmp.eq.f32.partialorder %v36_v12, inf  ;;  %v42_v15 = vand.u32 2147483648, %v36_v12  ;;  %vm41_vm1 = vcmp.eq.f32.partialorder %v36_v12, 0.0 }
  0xb7   :  { %v71_v13 = vpop.eup %70 }
  0xb8   :  { %v38_v14 = vmul.f32 %v71_v13, %v36_v12 }
  0xba   :  { %v40_v16 = vsel %vm39_vm0, %v36_v12, %v38_v14 }
  0xbb   :  { %v43_v17 = vsel %vm41_vm1, %v42_v15, %v40_v16 }
  0xbc   :  { %v44_v18 = vadd.f32 1e-05, %v43_v17 }
  0xbe   :  { %72 = vrcp.f32 %v44_v18 }
  0xc8   :  { %v73_v21 = vpop.eup %72 }
  0xc9   :  { %v49_v22 = vmul.f32 %v73_v21, %v47_v19  ;;  %v50_v23 = vmul.f32 %v73_v21, %v48_v20 }
  0xcb   :  { %51 = vst [vmem:[#allocation5] sm:$0xff] %v49_v22  ;;  %52 = vst [vmem:[#allocation5 + $0x8] sm:$0xff] %v50_v23 }
  0xcc   :  { %107 = shalt.err (!%p104_p12)
}
  0xcd   :  { %s108_s22 = scalar_lea.hbm %s159_s1, 256 }
  0xce   :  { %p109_p13 = scmp.ne.s32.totalorder %s159_s1, %s108_s22  ;;  %p112_p0 = scmp.lt.u32.totalorder %s108_s22, %s159_s1 }
  0xd0   :  { %p114_p1 = pnand %p112_p0, %p109_p13 }
  0xd2   :  { %117 = shalt.err (!%p114_p1)
}
  0xd3   :  { %62 = dma.vmem_to_hbm [thread:$0]  %s60_s18, 256, %s159_s1, [#allocation4]  }
  0xd4   :  { %120 = dma.done.wait [#allocation4], 256  }
  0xd5   :  { %121 = vsyncadd [#allocation4], 4294967040 }
  0xd6   :  { %66 = vsyncpa [#allocation3], 1 }
  0xd7   :  { %67 = vsyncpa [#allocation4], 1 }

</bundles_post_ra>
